<compile_context>
chip_gen: v7x
topology: tpu7x:2x2x1
jax: 0.10.0
libtpu: 0.0.40
codegen_flags: <defaults>
</compile_context>

<pallas_src>
import functools

import jax
import jax.numpy as jnp
import numpy as np
from jax.experimental import pallas as pl
from jax.experimental.pallas import tpu as pltpu

ANCHORS_PER_POSITION = 2    # config['anchors_per_position'] in the original repo
REG_COMPONENTS = 7
SMALL_ADDON = 1e-6

# Rows of the per-(batch, core-group) partial-sum output block.
_ROW_BCE_POS, _ROW_BCE_NEG, _ROW_REG, _ROW_POS_CNT, _ROW_NEG_CNT = range(5)
_OUT_ROWS = 8    # padded to a full sublane group


def _voxel_loss_kernel(prob_ref, code_ref, reg_ref, tgt_ref, out_ref, *,
                       n_anchors, n_spatial, tile, tiles_per_group, ragged):
    """Grid = (batch, core_group, spatial_tile).

    Refs per grid step (channel-major, lane dim = flattened spatial tile):
      prob: (A, T)    probabilities
      code: (A, T)    packed anchor masks, code = pos + 2*neg  (values 0..3)
      reg/tgt: (7A, T)
      out:  (8, T)    per-(batch, group) per-lane partial sums, accumulated
                      across the spatial-tile ("arbitrary") axis:
        row 0: sum pos*(-log p)  row 1: sum neg*(-log(1-p))
        row 2: sum pos*smooth_l1 row 3: sum pos  row 4: sum neg
    """
    g = pl.program_id(1)
    t = pl.program_id(2)

    @pl.when(t == 0)
    def _init():
        out_ref[...] = jnp.zeros_like(out_ref)

    prob = prob_ref[...].astype(jnp.float32)            # (A, T)
    code = code_ref[...].astype(jnp.float32)            # (A, T), in {0,1,2,3}
    neg = jnp.where(code >= 2.0, 1.0, 0.0)
    pos = code - 2.0 * neg                               # exact decode

    # PyTorch F.binary_cross_entropy clamps the log terms at -100.
    log_p = jnp.maximum(jnp.log(prob), -100.0)
    log_1mp = jnp.maximum(jnp.log(1.0 - prob), -100.0)

    bce_pos = jnp.sum(pos * (-log_p), axis=0, keepdims=True)
    bce_neg = jnp.sum(neg * (-log_1mp), axis=0, keepdims=True)

    # Smooth L1 (beta = 1.0, the PyTorch default).  Slice the *refs* per
    # anchor (static ref slices are free views) and reduce each 7-row group,
    # weighting by that anchor's positive mask.
    reg_row = jnp.zeros((1, tile), jnp.float32)
    for a in range(n_anchors):
        lo = REG_COMPONENTS * a
        hi = lo + REG_COMPONENTS
        d = reg_ref[lo:hi, :].astype(jnp.float32) - tgt_ref[lo:hi, :].astype(jnp.float32)
        ad = jnp.abs(d)
        sl1 = jnp.where(ad < 1.0, 0.5 * d * d, ad - 0.5)
        reg_row = reg_row + pos[a:a + 1, :] * jnp.sum(sl1, axis=0, keepdims=True)

    pos_cnt = jnp.sum(pos, axis=0, keepdims=True)
    neg_cnt = jnp.sum(neg, axis=0, keepdims=True)

    update = jnp.concatenate(
        [bce_pos, bce_neg, reg_row, pos_cnt, neg_cnt,
         jnp.zeros((_OUT_ROWS - 5, tile), jnp.float32)], axis=0)

    if ragged:
        # Lanes past the true spatial extent hold unspecified data (no HBM
        # padding is done); zero their contribution.  jnp.where/select does
        # not propagate NaN from the unselected branch, so garbage is safe.
        offset = (g * tiles_per_group + t) * tile
        lane = jax.lax.broadcasted_iota(jnp.int32, (1, tile), 1)
        update = jnp.where(offset + lane < n_spatial, update, 0.0)

    out_ref[...] += update


def _round_up(x, m):
    return (x + m - 1) // m * m


def _cdiv(a, b):
    return -(-a // b)


def _plan_tiling(n_spatial, batch, max_tile_lanes):
    """Balanced tiling: fewest tiles with lane width <= max_tile_lanes, each a
    multiple of 128; padding (handled by in-kernel masking, never in HBM) is
    at most 127 + 128*num_tiles lanes.  For B == 1 the tiles are split across
    two core groups so both TensorCores of a v7x chip get work."""
    n128 = _round_up(n_spatial, 128)
    max_tile = max(128, (int(max_tile_lanes) // 128) * 128)
    min_tiles = _cdiv(n128, max_tile)
    core_groups = 2 if (batch == 1 and n128 >= 256) else 1
    tiles_total = core_groups * _cdiv(min_tiles, core_groups)
    tile = _round_up(_cdiv(n128, tiles_total), 128)
    # Never emit a spatial block that lies entirely past the end of the array.
    if core_groups > 1 and tile * (tiles_total - 1) >= n_spatial:
        core_groups = 1
        tiles_total = min_tiles
        tile = _round_up(_cdiv(n128, tiles_total), 128)
    return tile, core_groups, tiles_total // core_groups


def _as_float(x):
    return x if jnp.issubdtype(x.dtype, jnp.floating) else x.astype(jnp.float32)


def voxel_loss(prob_score_map, reg_map, pos_equal_one, neg_equal_one, targets,
               *, alpha, beta, max_tile_lanes=32768, targets_dtype=None):
    """prob_score_map: (B, A, W, H)   reg_map: (B, 7A, W, H)
       pos/neg_equal_one: (B, W, H, A)   targets: (B, W, H, 7A)
       Returns (total_loss, bce_total, reg_loss) as float32 scalars."""
    B, A, W, H = prob_score_map.shape
    assert A == ANCHORS_PER_POSITION
    C = REG_COMPONENTS * A
    assert reg_map.shape == (B, C, W, H)
    assert pos_equal_one.shape == (B, W, H, A)
    assert neg_equal_one.shape == (B, W, H, A)
    assert targets.shape == (B, W, H, C)
    N = W * H

    # Conv outputs stay in native NCHW: flattening the spatial dims is a free
    # reshape (no HBM copy, no padding).  Narrow dtypes are cast in-kernel.
    prob_cm = _as_float(prob_score_map).reshape(B, A, N)
    reg_cm = _as_float(reg_map).reshape(B, C, N)

    # Channel-last masks are packed into a single channel-major code plane
    # (pos + 2*neg) as part of the transpose copy they needed anyway.
    code_cl = _as_float(pos_equal_one) + 2.0 * _as_float(neg_equal_one)
    code_cm = jnp.transpose(code_cl.reshape(B, N, A), (0, 2, 1))
    tgt = _as_float(targets)
    if targets_dtype is not None:
        tgt = tgt.astype(targets_dtype)     # e.g. jnp.bfloat16 to halve tgt bytes
    tgt_cm = jnp.transpose(tgt.reshape(B, N, C), (0, 2, 1))
    # TODO(synk): have the target-assignment / dataloader stage emit pos/neg and
    # targets channel-major (B, A, N) / (B, C, N) so these transposes vanish.

    tile, core_groups, tiles_per_group = _plan_tiling(N, B, max_tile_lanes)
    tiles_total = core_groups * tiles_per_group
    ragged = (tile * tiles_total) != N

    def spatial_idx(b, g, t):
        return (b, 0, g * tiles_per_group + t)

    small_spec = pl.BlockSpec((None, A, tile), spatial_idx)
    big_spec = pl.BlockSpec((None, C, tile), spatial_idx)
    out_spec = pl.BlockSpec((_OUT_ROWS, tile),
                            lambda b, g, t: (b * core_groups + g, 0))

    kernel = functools.partial(
        _voxel_loss_kernel, n_anchors=A, n_spatial=N, tile=tile,
        tiles_per_group=tiles_per_group, ragged=ragged)

    # Advisory cost estimate: the kernel is HBM-bandwidth bound.
    cost = pl.CostEstimate(
        flops=int(B * N * (10 * A + 8 * C)),
        transcendentals=int(2 * B * A * N),
        bytes_accessed=int(B * N * (prob_cm.dtype.itemsize * A + 4 * A
                                    + reg_cm.dtype.itemsize * C
                                    + tgt_cm.dtype.itemsize * C)
                           + B * core_groups * _OUT_ROWS * tile * 4))

    partials = pl.pallas_call(
        kernel,
        out_shape=jax.ShapeDtypeStruct((B * core_groups * _OUT_ROWS, tile),
                                       jnp.float32),
        grid=(B, core_groups, tiles_per_group),
        in_specs=[small_spec, small_spec, big_spec, big_spec],
        out_specs=out_spec,
        compiler_params=pltpu.CompilerParams(
            dimension_semantics=("parallel", "parallel", "arbitrary"),
            # ~9 MB actually used at tile=32768 (double-buffered); 32 MiB is a
            # comfortable explicit cap on every generation incl. v7x (64 MiB).
            vmem_limit_bytes=32 * 1024 * 1024),
        cost_estimate=cost,
    )(prob_cm, code_cm, reg_cm, tgt_cm)

    # Tiny epilogue: cross-lane / cross-batch reduction and normalization.
    sums = jnp.sum(partials.reshape(B * core_groups, _OUT_ROWS, tile), axis=(0, 2))
    pos_sum = sums[_ROW_POS_CNT]
    neg_sum = sums[_ROW_NEG_CNT]
    bce_pos = sums[_ROW_BCE_POS] / (pos_sum + SMALL_ADDON)
    bce_neg = sums[_ROW_BCE_NEG] / (neg_sum + SMALL_ADDON)
    bce_total = alpha * bce_pos + beta * bce_neg
    reg_loss = sums[_ROW_REG] / (pos_sum + SMALL_ADDON)
    total_loss = bce_total + reg_loss
    return total_loss, bce_total, reg_loss


def _reference(prob_score_map, reg_map, pos, neg, targets, alpha, beta):
    """Pure-JAX reference mirroring the PyTorch forward."""
    B, A, W, H = prob_score_map.shape
    prob = jnp.transpose(prob_score_map, (0, 2, 3, 1))
    reg = jnp.transpose(reg_map, (0, 2, 3, 1)).reshape(B, W, H, A, REG_COMPONENTS)
    tgt = targets.reshape(B, W, H, A, REG_COMPONENTS)
    log_p = jnp.maximum(jnp.log(prob), -100.0)
    log_1mp = jnp.maximum(jnp.log(1.0 - prob), -100.0)
    pos_sum = jnp.sum(pos)
    neg_sum = jnp.sum(neg)
    bce_pos = jnp.sum(pos * (-log_p)) / (pos_sum + SMALL_ADDON)
    bce_neg = jnp.sum(neg * (-log_1mp)) / (neg_sum + SMALL_ADDON)
    bce_total = alpha * bce_pos + beta * bce_neg
    d = reg - tgt
    ad = jnp.abs(d)
    sl1 = jnp.where(ad < 1.0, 0.5 * d * d, ad - 0.5)
    reg_loss = jnp.sum(pos[..., None] * sl1) / (pos_sum + SMALL_ADDON)
    return bce_total + reg_loss, bce_total, reg_loss


if __name__ == "__main__":
    alpha, beta = 1.5, 1.0   # VoxelNet defaults
    A = ANCHORS_PER_POSITION
    C = REG_COMPONENTS * A

    # (B, W, H, max_tile_lanes):
    #   case 1: several spatial tiles per batch, exact coverage (accumulation path)
    #   case 2: ragged multi-tile coverage (in-kernel tail masking)
    #   case 3: B == 1 -> spatial split across two core groups, ragged tail
    #   case 4: single partial tile larger than the spatial extent
    cases = [(2, 32, 32, 256), (2, 12, 30, 256), (1, 20, 23, 256), (2, 12, 12, 32768)]

    key = jax.random.PRNGKey(0)
    for (B, W, H, max_lanes) in cases:
        key, k1, k2, k3, k4, k5 = jax.random.split(key, 6)
        prob_score_map = jax.nn.sigmoid(
            jax.random.normal(k1, (B, A, W, H), jnp.float32))
        reg_map = jax.random.normal(k2, (B, C, W, H), jnp.float32)
        pos_equal_one = (jax.random.uniform(k3, (B, W, H, A)) < 0.1
                         ).astype(jnp.float32)
        neg_equal_one = ((jax.random.uniform(k4, (B, W, H, A)) < 0.5)
                         & (pos_equal_one < 0.5)).astype(jnp.float32)
        targets = jax.random.normal(k5, (B, W, H, C), jnp.float32)

        total, bce_total, reg_loss = voxel_loss(
            prob_score_map, reg_map, pos_equal_one, neg_equal_one, targets,
            alpha=alpha, beta=beta, max_tile_lanes=max_lanes)
        jax.block_until_ready((total, bce_total, reg_loss))

        ref_total, ref_bce, ref_reg = _reference(
            prob_score_map, reg_map, pos_equal_one, neg_equal_one, targets,
            alpha, beta)

        np.testing.assert_allclose(np.asarray(total), np.asarray(ref_total),
                                   rtol=2e-4, atol=1e-5)
        np.testing.assert_allclose(np.asarray(bce_total), np.asarray(ref_bce),
                                   rtol=2e-4, atol=1e-5)
        np.testing.assert_allclose(np.asarray(reg_loss), np.asarray(ref_reg),
                                   rtol=2e-4, atol=1e-5)

    print("KERNEL_OK")
</pallas_src>

<mosaic_0001>
module attributes {stable_mosaic.version = 11 : i64} {
  func.func @_voxel_loss_kernel(%arg0: i32, %arg1: i32, %arg2: i32, %arg3: memref<1x2x256xf32, #tpu.memory_space<vmem>>, %arg4: memref<1x2x256xf32, #tpu.memory_space<vmem>>, %arg5: memref<1x14x256xf32, #tpu.memory_space<vmem>>, %arg6: memref<1x14x256xf32, #tpu.memory_space<vmem>>, %arg7: memref<8x256xf32, #tpu.memory_space<vmem>>) attributes {dimension_semantics = [#tpu.dimension_semantics<parallel>, #tpu.dimension_semantics<parallel>, #tpu.dimension_semantics<arbitrary>], iteration_bounds = array<i64: 2, 1, 4>, scalar_prefetch = 0 : i64, scratch_operands = 0 : i64, tpu.core_type = #tpu.core_type<tc>, window_params = [{transform_indices = @transform_0, window_bounds = array<i64: 1, 2, 256>}, {transform_indices = @transform_1, window_bounds = array<i64: 1, 2, 256>}, {transform_indices = @transform_2, window_bounds = array<i64: 1, 14, 256>}, {transform_indices = @transform_3, window_bounds = array<i64: 1, 14, 256>}, {transform_indices = @transform_4, window_bounds = array<i64: 8, 256>}]} {
    %c0_i32 = arith.constant 0 : i32
    %0 = arith.cmpi eq, %arg2, %c0_i32 : i32
    %1 = arith.extui %0 : i1 to i32
    %c0_i32_0 = arith.constant 0 : i32
    %2 = arith.cmpi ne, %1, %c0_i32_0 : i32
    scf.if %2 {
      %cst_43 = arith.constant 0.000000e+00 : f32
      %81 = vector.broadcast %cst_43 : f32 to vector<8x256xf32>
      %c0_44 = arith.constant 0 : index
      %c0_45 = arith.constant 0 : index
      %82 = vector.load %arg7[%c0_44, %c0_45] : memref<8x256xf32, #tpu.memory_space<vmem>>, vector<8x256xf32>
      tpu.vector_store %arg7[%c0_44, %c0_45], %81 {strides = array<i32>} : memref<8x256xf32, #tpu.memory_space<vmem>>, vector<8x256xf32>,
    } else {
    }
    %c0 = arith.constant 0 : index
    %c0_1 = arith.constant 0 : index
    %c0_2 = arith.constant 0 : index
    %3 = vector.load %arg3[%c0, %c0_1, %c0_2] : memref<1x2x256xf32, #tpu.memory_space<vmem>>, vector<1x2x256xf32>
    %4 = vector.shape_cast %3 : vector<1x2x256xf32> to vector<2x256xf32>
    %c0_3 = arith.constant 0 : index
    %c0_4 = arith.constant 0 : index
    %c0_5 = arith.constant 0 : index
    %5 = vector.load %arg4[%c0_3, %c0_4, %c0_5] : memref<1x2x256xf32, #tpu.memory_space<vmem>>, vector<1x2x256xf32>
    %6 = vector.shape_cast %5 : vector<1x2x256xf32> to vector<2x256xf32>
    %cst = arith.constant 2.000000e+00 : f32
    %7 = vector.broadcast %cst : f32 to vector<2x256xf32>
    %8 = arith.cmpf oge, %6, %7 : vector<2x256xf32>
    %cst_6 = arith.constant 1.000000e+00 : f32
    %cst_7 = arith.constant 0.000000e+00 : f32
    %9 = vector.broadcast %cst_6 : f32 to vector<2x256xf32>
    %10 = vector.broadcast %cst_7 : f32 to vector<2x256xf32>
    %11 = arith.select %8, %9, %10 : vector<2x256xi1>, vector<2x256xf32>
    %cst_8 = arith.constant 2.000000e+00 : f32
    %12 = vector.broadcast %cst_8 : f32 to vector<2x256xf32>
    %13 = arith.mulf %12, %11 : vector<2x256xf32>
    %14 = arith.subf %6, %13 : vector<2x256xf32>
    %15 = math.log %4 : vector<2x256xf32>
    %cst_9 = arith.constant -1.000000e+02 : f32
    %16 = vector.broadcast %cst_9 : f32 to vector<2x256xf32>
    %17 = arith.maximumf %15, %16 : vector<2x256xf32>
    %cst_10 = arith.constant 1.000000e+00 : f32
    %18 = vector.broadcast %cst_10 : f32 to vector<2x256xf32>
    %19 = arith.subf %18, %4 : vector<2x256xf32>
    %20 = math.log %19 : vector<2x256xf32>
    %cst_11 = arith.constant -1.000000e+02 : f32
    %21 = vector.broadcast %cst_11 : f32 to vector<2x256xf32>
    %22 = arith.maximumf %20, %21 : vector<2x256xf32>
    %cst_12 = arith.constant 0.000000e+00 : f32
    %23 = vector.broadcast %cst_12 : f32 to vector<2x256xf32>
    %24 = arith.subf %23, %17 : vector<2x256xf32>
    %25 = arith.mulf %14, %24 : vector<2x256xf32>
    %cst_13 = arith.constant dense<0.000000e+00> : vector<256xf32>
    %26 = vector.multi_reduction <add>, %25, %cst_13 [0] : vector<2x256xf32> to vector<256xf32>
    %27 = vector.shape_cast %26 : vector<256xf32> to vector<1x256xf32>
    %cst_14 = arith.constant 0.000000e+00 : f32
    %28 = vector.broadcast %cst_14 : f32 to vector<2x256xf32>
    %29 = arith.subf %28, %22 : vector<2x256xf32>
    %30 = arith.mulf %11, %29 : vector<2x256xf32>
    %cst_15 = arith.constant dense<0.000000e+00> : vector<256xf32>
    %31 = vector.multi_reduction <add>, %30, %cst_15 [0] : vector<2x256xf32> to vector<256xf32>
    %32 = vector.shape_cast %31 : vector<256xf32> to vector<1x256xf32>
    %cst_16 = arith.constant 0.000000e+00 : f32
    %33 = vector.broadcast %cst_16 : f32 to vector<1x256xf32>
    %c0_17 = arith.constant 0 : index
    %c0_18 = arith.constant 0 : index
    %c0_19 = arith.constant 0 : index
    %34 = vector.load %arg5[%c0_17, %c0_18, %c0_19] : memref<1x14x256xf32, #tpu.memory_space<vmem>>, vector<1x7x256xf32>
    %35 = vector.shape_cast %34 : vector<1x7x256xf32> to vector<7x256xf32>
    %c0_20 = arith.constant 0 : index
    %c0_21 = arith.constant 0 : index
    %c0_22 = arith.constant 0 : index
    %36 = vector.load %arg6[%c0_20, %c0_21, %c0_22] : memref<1x14x256xf32, #tpu.memory_space<vmem>>, vector<1x7x256xf32>
    %37 = vector.shape_cast %36 : vector<1x7x256xf32> to vector<7x256xf32>
    %38 = arith.subf %35, %37 : vector<7x256xf32>
    %39 = math.absf %38 : vector<7x256xf32>
    %cst_23 = arith.constant 1.000000e+00 : f32
    %40 = vector.broadcast %cst_23 : f32 to vector<7x256xf32>
    %41 = arith.cmpf olt, %39, %40 : vector<7x256xf32>
    %cst_24 = arith.constant 5.000000e-01 : f32
    %42 = vector.broadcast %cst_24 : f32 to vector<7x256xf32>
    %43 = arith.mulf %42, %38 : vector<7x256xf32>
    %44 = arith.mulf %43, %38 : vector<7x256xf32>
    %cst_25 = arith.constant 5.000000e-01 : f32
    %45 = vector.broadcast %cst_25 : f32 to vector<7x256xf32>
    %46 = arith.subf %39, %45 : vector<7x256xf32>
    %47 = arith.select %41, %44, %46 : vector<7x256xi1>, vector<7x256xf32>
    %48 = vector.extract_strided_slice %14 {offsets = [0, 0], sizes = [1, 256], strides = [1, 1]} : vector<2x256xf32> to vector<1x256xf32>
    %cst_26 = arith.constant dense<0.000000e+00> : vector<256xf32>
    %49 = vector.multi_reduction <add>, %47, %cst_26 [0] : vector<7x256xf32> to vector<256xf32>
    %50 = vector.shape_cast %49 : vector<256xf32> to vector<1x256xf32>
    %51 = arith.mulf %48, %50 : vector<1x256xf32>
    %52 = arith.addf %33, %51 : vector<1x256xf32>
    %c0_27 = arith.constant 0 : index
    %c7 = arith.constant 7 : index
    %c0_28 = arith.constant 0 : index
    %53 = vector.load %arg5[%c0_27, %c7, %c0_28] : memref<1x14x256xf32, #tpu.memory_space<vmem>>, vector<1x7x256xf32>
    %54 = vector.shape_cast %53 : vector<1x7x256xf32> to vector<7x256xf32>
    %c0_29 = arith.constant 0 : index
    %c7_30 = arith.constant 7 : index
    %c0_31 = arith.constant 0 : index
    %55 = vector.load %arg6[%c0_29, %c7_30, %c0_31] : memref<1x14x256xf32, #tpu.memory_space<vmem>>, vector<1x7x256xf32>
    %56 = vector.shape_cast %55 : vector<1x7x256xf32> to vector<7x256xf32>
    %57 = arith.subf %54, %56 : vector<7x256xf32>
    %58 = math.absf %57 : vector<7x256xf32>
    %cst_32 = arith.constant 1.000000e+00 : f32
    %59 = vector.broadcast %cst_32 : f32 to vector<7x256xf32>
    %60 = arith.cmpf olt, %58, %59 : vector<7x256xf32>
    %cst_33 = arith.constant 5.000000e-01 : f32
    %61 = vector.broadcast %cst_33 : f32 to vector<7x256xf32>
    %62 = arith.mulf %61, %57 : vector<7x256xf32>
    %63 = arith.mulf %62, %57 : vector<7x256xf32>
    %cst_34 = arith.constant 5.000000e-01 : f32
    %64 = vector.broadcast %cst_34 : f32 to vector<7x256xf32>
    %65 = arith.subf %58, %64 : vector<7x256xf32>
    %66 = arith.select %60, %63, %65 : vector<7x256xi1>, vector<7x256xf32>
    %67 = vector.extract_strided_slice %14 {offsets = [1, 0], sizes = [1, 256], strides = [1, 1]} : vector<2x256xf32> to vector<1x256xf32>
    %cst_35 = arith.constant dense<0.000000e+00> : vector<256xf32>
    %68 = vector.multi_reduction <add>, %66, %cst_35 [0] : vector<7x256xf32> to vector<256xf32>
    %69 = vector.shape_cast %68 : vector<256xf32> to vector<1x256xf32>
    %70 = arith.mulf %67, %69 : vector<1x256xf32>
    %71 = arith.addf %52, %70 : vector<1x256xf32>
    %cst_36 = arith.constant dense<0.000000e+00> : vector<256xf32>
    %72 = vector.multi_reduction <add>, %14, %cst_36 [0] : vector<2x256xf32> to vector<256xf32>
    %73 = vector.shape_cast %72 : vector<256xf32> to vector<1x256xf32>
    %cst_37 = arith.constant dense<0.000000e+00> : vector<256xf32>
    %74 = vector.multi_reduction <add>, %11, %cst_37 [0] : vector<2x256xf32> to vector<256xf32>
    %75 = vector.shape_cast %74 : vector<256xf32> to vector<1x256xf32>
    %cst_38 = arith.constant 0.000000e+00 : f32
    %76 = vector.broadcast %cst_38 : f32 to vector<3x256xf32>
    %77 = tpu.concatenate %27, %32, %71, %73, %75, %76 in 0 : vector<1x256xf32>, vector<1x256xf32>, vector<1x256xf32>, vector<1x256xf32>, vector<1x256xf32>, vector<3x256xf32> -> vector<8x256xf32>
    %c0_39 = arith.constant 0 : index
    %c0_40 = arith.constant 0 : index
    %78 = vector.load %arg7[%c0_39, %c0_40] : memref<8x256xf32, #tpu.memory_space<vmem>>, vector<8x256xf32>
    %79 = arith.addf %78, %77 : vector<8x256xf32>
    %c0_41 = arith.constant 0 : index
    %c0_42 = arith.constant 0 : index
    %80 = vector.load %arg7[%c0_41, %c0_42] : memref<8x256xf32, #tpu.memory_space<vmem>>, vector<8x256xf32>
    tpu.vector_store %arg7[%c0_41, %c0_42], %79 {strides = array<i32>} : memref<8x256xf32, #tpu.memory_space<vmem>>, vector<8x256xf32>,
    return
  }
  func.func @transform_0(%arg0: i32, %arg1: i32, %arg2: i32) -> (i32, i32, i32) {
    %c4_i32 = arith.constant 4 : i32
    %0 = arith.muli %arg1, %c4_i32 : i32
    %1 = arith.addi %0, %arg2 : i32
    %c0_i32 = arith.constant 0 : i32
    %c0_i32_0 = arith.constant 0 : i32
    return %arg0, %c0_i32, %1 : i32, i32, i32
  }
  func.func @transform_1(%arg0: i32, %arg1: i32, %arg2: i32) -> (i32, i32, i32) {
    %c4_i32 = arith.constant 4 : i32
    %0 = arith.muli %arg1, %c4_i32 : i32
    %1 = arith.addi %0, %arg2 : i32
    %c0_i32 = arith.constant 0 : i32
    %c0_i32_0 = arith.constant 0 : i32
    return %arg0, %c0_i32, %1 : i32, i32, i32
  }
  func.func @transform_2(%arg0: i32, %arg1: i32, %arg2: i32) -> (i32, i32, i32) {
    %c4_i32 = arith.constant 4 : i32
    %0 = arith.muli %arg1, %c4_i32 : i32
    %1 = arith.addi %0, %arg2 : i32
    %c0_i32 = arith.constant 0 : i32
    %c0_i32_0 = arith.constant 0 : i32
    return %arg0, %c0_i32, %1 : i32, i32, i32
  }
  func.func @transform_3(%arg0: i32, %arg1: i32, %arg2: i32) -> (i32, i32, i32) {
    %c4_i32 = arith.constant 4 : i32
    %0 = arith.muli %arg1, %c4_i32 : i32
    %1 = arith.addi %0, %arg2 : i32
    %c0_i32 = arith.constant 0 : i32
    %c0_i32_0 = arith.constant 0 : i32
    return %arg0, %c0_i32, %1 : i32, i32, i32
  }
  func.func @transform_4(%arg0: i32, %arg1: i32, %arg2: i32) -> (i32, i32) {
    %c1_i32 = arith.constant 1 : i32
    %0 = arith.muli %arg0, %c1_i32 : i32
    %1 = arith.addi %0, %arg1 : i32
    %c0_i32 = arith.constant 0 : i32
    %c0_i32_0 = arith.constant 0 : i32
    return %1, %c0_i32 : i32, i32
  }
}

</mosaic_0001>

<bundles_post_ra>
// kernel: tpu_custom_call.1
= control target key start
LH: loop header
LB: loop body
LE: loop exit
PB: predicated region body
PF: predicated region fallthrough
CT: control target
= control target key end

     0   :  { %s1413_s0 = inlined_call_operand.vmem [shape: f32[2,2,1024], index: 0, kind: input, shape index: {}]   ;;  %s1414_s1 = inlined_call_operand.vmem [shape: f32[2,2,1024], index: 1, kind: input, shape index: {}]   ;;  %s1415_s2 = inlined_call_operand.vmem [shape: f32[2,14,1024], index: 2, kind: input, shape index: {}]   ;;  %s1416_s3 = inlined_call_operand.vmem [shape: f32[2,14,1024], index: 3, kind: input, shape index: {}]   ;;  %s1417_s4 = inlined_call_operand.hbm [shape: f32[16,256], index: 4, kind: output, shape index: {}]  }
   0x1   :  { %1422 = sst [smem:[#allocation10_spill]] %s1415_s2 }
   0x2   :  { %1423 = sst [smem:[#allocation11_spill]] %s1416_s3 }
   0x3   :  { %9 = vsyncpa [#allocation5], 0 }
   0x4   :  { %11 = vsyncpa [#allocation5 + $0x1], 0  ;;  %s1128_s15 = smov 0   ;;  %s1130_s16 = smov 0  }
   0x5   :  { %s1132_s17 = smov 0   ;;  %s1134_s18 = smov 0  }
   0x6   :  { %s1136_s19 = smov 0   ;;  %s1138_s20 = smov 0  }
   0x7   :  { %s1140_s21 = smov 0   ;;  %s1142_s22 = smov 0  }
   0x8   :  { %s1144_s23 = smov 0   ;;  %s1146_s24 = smov 0  }
   0x9 LB: > { %1424 = sst [smem:[#allocation7_spill]] %s1093_s23  ;;  %s857_s25 = sadd.s32 4294967295, %s1097_s24   ;;  %s1097_s24 = sphi %s1146_s24, %s17_s24   ;;  %s1093_s23 = sphi %s1144_s23, %s1445_s23   ;;  %s1089_s22 = sphi %s1142_s22, %s1452_s22   ;;  %s1085_s21 = sphi %s1140_s21, %s1443_s21   ;;  %s1081_s20 = sphi %s1138_s20, %s1451_s20   ;;  %s1077_s19 = sphi %s1136_s19, %s1450_s19   ;;  %s1073_s18 = sphi %s1134_s18, %s1449_s18   ;;  %s1069_s17 = sphi %s1132_s17, %s1448_s17   ;;  %s1065_s16 = sphi %s1130_s16, %s1447_s16   ;;  %s1061_s15 = sphi %s1128_s15, %s1446_s15  }
   0xa   : > { %s858_s26 = sadd.s32 4294967294, %s1097_s24   ;;  %s29_s27 = sadd.s32 1, %s1089_s22 }
   0xb   : > { %s36_s28 = sadd.s32 1, %s1093_s23  ;;  %p30_p0 = scmp.ge.s32.totalorder %s29_s27, 4 }
   0xc   : > { %s113_s29 = sadd.s32 1, %s1077_s19  ;;  %p120_p1 = scmp.ne.s32.totalorder %s1077_s19, %s1073_s18 }
   0xd   : > { %p121_p2 = scmp.eq.s32.totalorder %s1097_s24, 0  ;;  %s1454_s27 = smov (%p30_p0, %s29_s27), 0 }
   0xe   : > { %1425 = sst [smem:[#allocation8_spill]] %s1454_s27  ;;  %s1456_s28 = smov (!%p30_p0, %s36_s28), %s1093_s23 }
   0xf   : > { %s109_s30 = ssub.s32 %s1089_s22, %s1454_s27  ;;  %p1191_p3 = por %p121_p2, %p120_p1 }
  0x10   : > { %p38_p4 = scmp.ge.s32.totalorder %s1456_s28, 2  ;;  %s173_s6 = sadd.s32 1, %s1069_s17 }
  0x11   : > { %p183_p5 = scmp.ne.s32.totalorder %s1069_s17, %s1065_s16  ;;  %p184_p6 = scmp.eq.s32.totalorder %s857_s25, 7 }
  0x12   : > { %s1458_s28 = smov (%p38_p4, %s1456_s28), 0  ;;  %p189_p8 = scmp.ne.s32.totalorder %s1065_s16, %s1061_s15 }
  0x13   : > { %1427 = sst [smem:[#allocation9_spill]] %s1458_s28  ;;  %p1200_p7 = por %p184_p6, %p183_p5 }
  0x14   : > { %s108_s8 = ssub.s32 %s1093_s23, %s1458_s28  ;;  %p190_p9 = scmp.eq.s32.totalorder %s858_s26, 7 }
  0x15   : > { %s110_s9 = sor.u32 %s109_s30, %s108_s8  ;;  %p171_p10 = scmp.eq.s32.totalorder %s108_s8, 0 }
  0x16   : > { %p111_p11 = scmp.eq.s32.totalorder %s110_s9, 0  ;;  %p1208_p12 = por %p190_p9, %p189_p8 }
  0x17   : > { %s1213_s11 = scalar_select %p171_p10, %s1069_s17, %s173_s6  }
  0x18   : > { %s1216_s12 = scalar_select %p111_p11, %s1077_s19, %s113_s29  }
  0x19   : > { %p860_p13 = scmp.ge.s32.totalorder %s1097_s24, 8 }
  0x1b   : > { %206 = sbr.rel (%p860_p13) target bundleno = 58 (0x3a), region = 16 }
  0x22   : > { %243 = sbr.rel (!%p1191_p3) target bundleno = 46 (0x2e), region = 28  ;;  %s245_s13 = sand.u32 (%p1191_p3), 1, %s1077_s19  }
  0x23   : > { %s862_s14 = sshll.u32 (%p1191_p3), %s1089_s22, 1  ;;  %s861_s25 = sshll.u32 (%p1191_p3), %s245_s13, 5 }
  0x24   : > { %s863_s26 = sshll.u32 (%p1191_p3), %s1093_s23, 4  ;;  %s1430_s2 = sld [smem:[#allocation10_spill]] (%p1191_p3) }
  0x25   : > { %s252_s30 = sadd.s32 (%p1191_p3), %s863_s26, %s862_s14  ;;  %s247_s28 = scalar_lea.vmem (%p1191_p3), [#allocation2], %s861_s25 }
  0x26   : > { %s864_s8 = sshll.u32 (%p1191_p3), %s252_s30, 3 }
  0x2a   : > { %s254_s29 = scalar_lea.vmem %s1430_s2, %s864_s8 }
  0x2b   : > { %v267_v0 = vld [vmem:[%s254_s29] sm:$0xff]  ;;  %v269_v1 = vld [vmem:[%s254_s29 + $0x8] sm:$0xff] }
  0x2c   : > { %v271_v2 = vld [vmem:[%s254_s29 + $0x40] sm:$0xff]  ;;  %268 = vst [vmem:[%s247_s28] sm:$0xff] %v267_v0  ;;  %270 = vst [vmem:[%s247_s28 + $0x8] sm:$0xff] %v269_v1  ;;  %v273_v3 = vld [vmem:[%s254_s29 + $0x48] sm:$0xff] }
  0x2d   : > { %272 = vst [vmem:[%s247_s28 + $0x10] sm:$0xff] %v271_v2  ;;  %274 = vst [vmem:[%s247_s28 + $0x18] sm:$0xff] %v273_v3 }
  0x2e PF: > { %280 = sbr.rel (!%p1191_p3) target bundleno = 58 (0x3a), region = 51  ;;  %s282_s13 = sand.u32 (%p1191_p3), 1, %s1077_s19  }
  0x2f   : > { %s866_s14 = sshll.u32 (%p1191_p3), %s1089_s22, 1  ;;  %s865_s26 = sshll.u32 (%p1191_p3), %s282_s13, 5 }
  0x30   : > { %s867_s30 = sshll.u32 (%p1191_p3), %s1093_s23, 4  ;;  %s1431_s3 = sld [smem:[#allocation11_spill]] (%p1191_p3) }
  0x31   : > { %s289_s8 = sadd.s32 (%p1191_p3), %s867_s30, %s866_s14  ;;  %s284_s28 = scalar_lea.vmem (%p1191_p3), [#allocation3], %s865_s26 }
  0x32   : > { %s868_s9 = sshll.u32 (%p1191_p3), %s289_s8, 3 }
  0x36   : > { %s291_s2 = scalar_lea.vmem %s1431_s3, %s868_s9 }
  0x37   : > { %v304_v4 = vld [vmem:[%s291_s2] sm:$0xff]  ;;  %v306_v5 = vld [vmem:[%s291_s2 + $0x8] sm:$0xff] }
  0x38   : > { %v308_v6 = vld [vmem:[%s291_s2 + $0x40] sm:$0xff]  ;;  %305 = vst [vmem:[%s284_s28] sm:$0xff] %v304_v4  ;;  %307 = vst [vmem:[%s284_s28 + $0x8] sm:$0xff] %v306_v5  ;;  %v310_v7 = vld [vmem:[%s291_s2 + $0x48] sm:$0xff] }
  0x39   : > { %309 = vst [vmem:[%s284_s28 + $0x10] sm:$0xff] %v308_v6  ;;  %311 = vst [vmem:[%s284_s28 + $0x18] sm:$0xff] %v310_v7 }
  0x3a PF: > { %p869_p0 = scmp.ge.s32.totalorder %s1097_s24, 1  ;;  %p316_p1 = scmp.lt.s32.totalorder %s1097_s24, 9 }
  0x3c   : > { %p317_p2 = pnand %p869_p0, %p316_p1 }
  0x3d   : > { %s323_s5 = sand.u32 (!%p317_p2), 1, %s1073_s18   ;;  %s1421_s29 = sand.u32 (!%p317_p2), 1, %s1065_s16  }
  0x3e   : > { %320 = sbr.rel (%p317_p2) target bundleno = 149 (0x95), region = 74  ;;  %s870_s13 = sshll.u32 (!%p317_p2), %s323_s5, 5 }
  0x3f   : > { %s872_s2 = sshll.u32 (!%p317_p2), %s1421_s29, 4  ;;  %s873_s14 = sshll.u32 (!%p317_p2), %s1081_s20, 1 }
  0x40   : > { %p384_p3 = scmp.lt.s32.totalorder (!%p317_p2), %s1085_s21, 1  ;;  %p386_p4 = scmp.lt.s32.totalorder (!%p317_p2), %s873_s14, 7 }
  0x41   : > { %s1250_s23 = scalar_lea.vmem (!%p317_p2), [#allocation2], %s870_s13  ;;  %s1252_s5 = scalar_lea.vmem (!%p317_p2), [#allocation3], %s870_s13 }
  0x42   : > { %s1254_s29 = scalar_lea.vmem (!%p317_p2), [#allocation4], %s872_s2  ;;  %p879_p5 = scmp.ne.s32.totalorder (!%p317_p2), %s1081_s20, 0 }
  0x45   : > { %s385_s26 = scalar_select %p384_p3, %s1085_s21, 1 }
  0x46   : > { %s1460_s14 = smov (!%p386_p4, %s873_s14), 7  ;;  %419 = sbr.rel (%p879_p5) target bundleno = 77 (0x4d), region = 86 }
  0x47   : > { %s874_s30 = sshll.u32 %s385_s26, 3  ;;  %v1099_v8 = vmov (!%p879_p5), 0.0  }
  0x48   : > { %s389_s8 = sadd.s32 %s874_s30, %s1460_s14  ;;  %420 = vst [vmem:[%s1254_s29] sm:$0xff] (!%p879_p5), %v1099_v8  ;;  %421 = vst [vmem:[%s1254_s29 + $0x8] sm:$0xff] (!%p879_p5), %v1099_v8 }
  0x49   : > { %s875_s9 = sshll.u32 %s389_s8, 1 }
  0x4a   : > { %s391_s28 = scalar_lea.vmem %s1413_s0, %s875_s9  ;;  %s405_s18 = scalar_lea.vmem %s1414_s1, %s875_s9 }
  0x4d PF: > { %v422_v9 = vld [vmem:[%s391_s28] sm:$0xf]  ;;  %v441_v11 = vlaneseq  ;;  %v1100_v14 = vmov 0.0   ;;  %v1101_v16 = vmov 1983009808   ;;  %vm508_vm1 = vcmask 1046528  }
  0x4e   : > { %v423_v10 = vld [vmem:[%s405_s18] sm:$0xf]  ;;  %983 = vlog2.f32 %v422_v9  ;;  %v431_v12 = vsub.f32 1.0, %v422_v9  ;;  %v439_v17 = vunpack.c.l.s4 %v1101_v16  ;;  %v491_v18 = vld [vmem:[%s1250_s23 + $0x8] sm:$0x7f]  ;;  %vm448_vm4 = vcmask 1041408  }
  0x4f   : > { %vm424_vm0 = vcmp.ge.f32.partialorder %v423_v10, 2.0  ;;  %v490_v13 = vld [vmem:[%s1250_s23] sm:$0x7f]  ;;  %v1265_v21 = vshrl.u32 %v441_v11, 7  ;;  %v493_v22 = vld [vmem:[%s1252_s5 + $0x8] sm:$0x7f] }
  0x50   : > { %v1260_v15 = vsel %vm424_vm0, 1.0, %v1100_v14  ;;  %v492_v19 = vld [vmem:[%s1252_s5] sm:$0x7f]  ;;  %985 = vlog2.f32 %v431_v12  ;;  %v536_v24 = vld [vmem:[%s1250_s23] sm:$0x80]  ;;  %v495_v25 = vsub.f32 %v491_v18, %v493_v22  ;;  %v440_v32 = vunpack.c.0.s8 %v439_v17  ;;  %s892_s3 = sshll.u32 %s1085_s21, 8 }
  0x51   : > { %v426_v20 = vmul.f32 2.0, %v1260_v15  ;;  %v494_v23 = vsub.f32 %v490_v13, %v492_v19  ;;  %v537_v26 = vld [vmem:[%s1250_s23 + $0x8] sm:$0x80]  ;;  %v538_v27 = vld [vmem:[%s1250_s23 + $0x10] sm:$0x3f]  ;;  %vm576_vm9 = vcmask 1040384   ;;  %s1350_s13 = scalar_lea.hbm %s1417_s4, %s892_s3 }
  0x52   : > { %v539_v28 = vld [vmem:[%s1250_s23 + $0x18] sm:$0x3f]  ;;  %v540_v31 = vld [vmem:[%s1252_s5] sm:$0x80]  ;;  %v497_v33 = vand.u32 2147483647, %v495_v25  ;;  %v1287_v59 = vsub.s32 %v440_v32, %v1265_v21 }
  0x53   : > { %v496_v29 = vand.u32 2147483647, %v494_v23  ;;  %v500_v30 = vmul.f32 0.5, %v494_v23  ;;  %v501_v34 = vmul.f32 0.5, %v495_v25  ;;  %v541_v35 = vld [vmem:[%s1252_s5 + $0x8] sm:$0x80]  ;;  %v544_v36 = vsub.f32 %v536_v24, %v540_v31 }
  0x54   : > { %v542_v40 = vld [vmem:[%s1252_s5 + $0x10] sm:$0x3f]  ;;  %v543_v41 = vld [vmem:[%s1252_s5 + $0x18] sm:$0x3f]  ;;  %v545_v42 = vsub.f32 %v537_v26, %v541_v35  ;;  %vm499_vm3 = vcmp.lt.f32.partialorder %v497_v33, 1.0  ;;  %v881_v44 = vadd.f32 -0.5, %v497_v33  ;;  %v1282_v50 = vsub.f32 %v423_v10, %v426_v20 }
  0x55   : > { %vm1274_vm2 = vcmp.lt.f32.partialorder %v496_v29, 1.0  ;;  %v502_v38 = vmul.f32 %v500_v30, %v494_v23  ;;  %v880_v39 = vadd.f32 -0.5, %v496_v29  ;;  %v503_v43 = vmul.f32 %v501_v34, %v495_v25  ;;  %s713_s20 = sshll.u32 %s1254_s29, 4  ;;  %s1442_s21 = sand.u32 1, %s1065_s16   ;;  %s1352_s20 = int_to_ptr.vmem [resolvable:$true] %s713_s20 }
  0x56   : > { %v546_v45 = vsub.f32 %v538_v27, %v542_v40  ;;  %v547_v47 = vsub.f32 %v539_v28, %v543_v41  ;;  %v548_v48 = vand.u32 2147483647, %v544_v36  ;;  %v549_v49 = vand.u32 2147483647, %v545_v42  ;;  %s698_s2 = scalar_lea.sflag [#allocation5], %s1442_s21  ;;  %s987_s14 = scalar_lea.vmem %s1352_s20, 256 }
  0x57   : > { %v506_v46 = vsel %vm1274_vm2, %v502_v38, %v880_v39  ;;  %v507_v51 = vsel %vm499_vm3, %v503_v43, %v881_v44  ;;  %v556_v57 = vmul.f32 0.5, %v544_v36  ;;  %v557_v1 = vmul.f32 0.5, %v545_v42  ;;  %p988_p6 = scmp.ne.s32.totalorder %s1352_s20, %s987_s14  ;;  %s1102_s26 = smov [#allocation4]  }
  0x58   : > { %v509_v52 = vsel %vm508_vm1, %v506_v46, 0.0  ;;  %v984_v53 = vpop.eup %983  ;;  %v516_v55 = vsel %vm508_vm1, %v507_v51, 0.0  ;;  %v550_v56 = vand.u32 2147483647, %v546_v45  ;;  %v551_v61 = vand.u32 2147483647, %v547_v47 }
  0x59   : > { %v510_v54 = vrot.slane %v509_v52, 4  ;;  %v429_v58 = vmul.f32 0.6931472, %v984_v53  ;;  %v517_v60 = vrot.slane %v516_v55, 4  ;;  %vm1289_vm5 = vcmp.lt.f32.partialorder %v548_v48, 1.0  ;;  %p989_p8 = pnand %p988_p6, %p1200_p7  ;;  %s991_s30 = sshll.u32 %s1102_s26, 4  ;;  %s992_s30 = int_to_ptr.vmem [resolvable:$false] %s991_s30 }
  0x5a   : > { %v986_v62 = vpop.eup %985  ;;  %vm1293_vm6 = vcmp.lt.f32.partialorder %v549_v49, 1.0  ;;  %v558_v2 = vmul.f32 0.5, %v546_v45  ;;  %v559_v6 = vmul.f32 0.5, %v547_v47  ;;  %v560_v8 = vmul.f32 %v556_v57, %v544_v36  ;;  %s993_s8 = scalar_lea.vmem %s992_s30, 512  ;;  %p994_p10 = scmp.lt.s32.totalorder %s1352_s20, %s992_s30 }
  0x5b   : > { %v430_v3 = vmax.f32 %v429_v58, -100.0  ;;  %v433_v4 = vmul.f32 0.6931472, %v986_v62  ;;  %v511_v5 = vadd.f32 %v510_v54, %v509_v52  ;;  %v518_v7 = vadd.f32 %v517_v60, %v516_v55  ;;  %p990_p9 = pneg %p989_p8  ;;  %p995_p11 = scmp.lt.s32.totalorder %s993_s8, %s987_s14 }
  0x5c   : > { %v561_v9 = vmul.f32 %v557_v1, %v545_v42  ;;  %v562_v10 = vmul.f32 %v558_v2, %v546_v45  ;;  %vm1297_vm7 = vcmp.lt.f32.partialorder %v550_v56, 1.0  ;;  %v563_v14 = vmul.f32 %v559_v6, %v547_v47 }
  0x5d   : > { %v434_v11 = vmax.f32 %v433_v4, -100.0  ;;  %v435_v12 = vsub.f32 0.0, %v430_v3  ;;  %vm1301_vm8 = vcmp.lt.f32.partialorder %v551_v61, 1.0  ;;  %v882_v17 = vadd.f32 -0.5, %v548_v48  ;;  %p996_p13 = por %p995_p11, %p994_p10 }
  0x5e   : > { %v883_v18 = vadd.f32 -0.5, %v549_v49  ;;  %v884_v19 = vadd.f32 -0.5, %v550_v56  ;;  %v512_v23 = vrot.slane %v511_v5, 2  ;;  %v885_v24 = vadd.f32 -0.5, %v551_v61 }
  0x5f   : > { %v436_v20 = vmul.f32 %v435_v12, %v1282_v50  ;;  %v463_v22 = vsub.f32 0.0, %v434_v11  ;;  %v519_v25 = vrot.slane %v518_v7, 2  ;;  %v568_v26 = vsel %vm1289_vm5, %v560_v8, %v882_v17  ;;  %p997_p0 = pnand %p996_p13, %p990_p9 }
  0x60   : > { %v569_v27 = vsel %vm1293_vm6, %v561_v9, %v883_v18  ;;  %v570_v28 = vsel %vm1297_vm7, %v562_v10, %v884_v19  ;;  %v571_v31 = vsel %vm1301_vm8, %v563_v14, %v885_v24  ;;  %v577_v32 = vrot.slane %v568_v26, 7 }
  0x61   : > { %v444_v29 = vrot.slane %v436_v20, %v1287_v59  ;;  %v464_v30 = vmul.f32 %v463_v22, %v1260_v15  ;;  %v578_v33 = vrot.slane %v570_v28, 7  ;;  %v580_v34 = vrot.slane %v569_v27, 7 }
  0x62   : > { %v513_v38 = vadd.f32 %v512_v23, %v511_v5  ;;  %v520_v39 = vadd.f32 %v519_v25, %v518_v7  ;;  %v581_v41 = vrot.slane %v571_v31, 7  ;;  %v624_v45 = vrot.slane %v1282_v50, %v1287_v59 }
  0x63   : > { %v445_v35 = vcombine.high %v444_v29, %v444_v29  ;;  %v449_v36 = vsel %vm448_vm4, %v444_v29, 0.0  ;;  %v472_v37 = vrot.slane %v464_v30, %v1287_v59  ;;  %v579_v40 = vsel %vm576_vm9, %v577_v32, %v578_v33 }
  0x64   : > { %v450_v46 = vrot.slane %v449_v36, 4  ;;  %v582_v49 = vsel %vm576_vm9, %v580_v34, %v581_v41  ;;  %v585_v52 = vsel %vm508_vm1, %v579_v40, 0.0  ;;  %v514_v55 = vrot.slane %v513_v38, 1 }
  0x65   : > { %v456_v42 = vsel %vm448_vm4, %v445_v35, 0.0  ;;  %v473_v43 = vcombine.high %v472_v37, %v472_v37  ;;  %v476_v44 = vsel %vm448_vm4, %v472_v37, 0.0  ;;  %v592_v53 = vsel %vm508_vm1, %v582_v49, 0.0 }
  0x66   : > { %v457_v47 = vrot.slane %v456_v42, 4  ;;  %v477_v48 = vrot.slane %v476_v44, 4  ;;  %v521_v56 = vrot.slane %v520_v39, 1  ;;  %v586_v57 = vrot.slane %v585_v52, 4 }
  0x67   : > { %v483_v51 = vsel %vm448_vm4, %v473_v43, 0.0  ;;  %v593_v58 = vrot.slane %v592_v53, 4  ;;  %v625_v60 = vcombine.high %v624_v45, %v624_v45  ;;  %v451_v61 = vadd.f32 %v450_v46, %v449_v36 }
  0x68   : > { %v484_v54 = vrot.slane %v483_v51, 4  ;;  %v458_v62 = vadd.f32 %v457_v47, %v456_v42  ;;  %v478_v63 = vadd.f32 %v477_v48, %v476_v44  ;;  %v587_v1 = vadd.f32 %v586_v57, %v585_v52 }
  0x69   : > { %v594_v2 = vadd.f32 %v593_v58, %v592_v53  ;;  %v628_v3 = vsel %vm448_vm4, %v624_v45, 0.0  ;;  %v635_v4 = vsel %vm448_vm4, %v625_v60, 0.0  ;;  %v515_v5 = vadd.f32 %v514_v55, %v513_v38 }
  0x6a   : > { %v485_v0 = vadd.f32 %v484_v54, %v483_v51  ;;  %v522_v6 = vadd.f32 %v521_v56, %v520_v39  ;;  %v588_v7 = vrot.slane %v587_v1, 2  ;;  %v629_v9 = vrot.slane %v628_v3, 4 }
  0x6b   : > { %v595_v8 = vrot.slane %v594_v2, 2  ;;  %v636_v10 = vrot.slane %v635_v4, 4  ;;  %v452_v11 = vrot.slane %v451_v61, 2  ;;  %v459_v12 = vrot.slane %v458_v62, 2 }
  0x6c   : > { %v479_v13 = vrot.slane %v478_v63, 2  ;;  %v486_v14 = vrot.slane %v485_v0, 2  ;;  %v589_v16 = vadd.f32 %v588_v7, %v587_v1  ;;  %v630_v18 = vadd.f32 %v629_v9, %v628_v3 }
  0x6d   : > { %v596_v17 = vadd.f32 %v595_v8, %v594_v2  ;;  %v637_v19 = vadd.f32 %v636_v10, %v635_v4  ;;  %v649_v20 = vrot.slane %v1260_v15, %v1287_v59  ;;  %v525_v22 = vcombine.low %v515_v5, %v522_v6 }
  0x6e   : > { %v590_v23 = vrot.slane %v589_v16, 1  ;;  %v453_v25 = vadd.f32 %v452_v11, %v451_v61  ;;  %v460_v26 = vadd.f32 %v459_v12, %v458_v62  ;;  %v480_v29 = vadd.f32 %v479_v13, %v478_v63 }
  0x6f   : > { %v597_v24 = vrot.slane %v596_v17, 1  ;;  %v650_v27 = vcombine.high %v649_v20, %v649_v20  ;;  %v653_v28 = vsel %vm448_vm4, %v649_v20, 0.0  ;;  %v487_v30 = vadd.f32 %v486_v14, %v485_v0  ;;  %v691_v14 = vld [vmem:[%s1254_s29] sm:$0xff] }
  0x70   : > { %v591_v31 = vadd.f32 %v590_v23, %v589_v16  ;;  %v631_v33 = vrot.slane %v630_v18, 2  ;;  %v638_v34 = vrot.slane %v637_v19, 2  ;;  %v654_v35 = vrot.slane %v653_v28, 4  ;;  %v692_v16 = vld [vmem:[%s1254_s29 + $0x8] sm:$0xff] }
  0x71   : > { %v598_v32 = vadd.f32 %v597_v24, %v596_v17  ;;  %v660_v36 = vsel %vm448_vm4, %v650_v27, 0.0  ;;  %v454_v15 = vrot.slane %v453_v25, 1  ;;  %v532_v39 = vrot.slane %v525_v22, %v1287_v59 }
  0x72   : > { %v661_v38 = vrot.slane %v660_v36, 4  ;;  %v655_v40 = vadd.f32 %v654_v35, %v653_v28  ;;  %v461_v41 = vrot.slane %v460_v26, 1  ;;  %v481_v42 = vrot.slane %v480_v29, 1 }
  0x73   : > { %v601_v37 = vcombine.low %v591_v31, %v598_v32  ;;  %v488_v45 = vrot.slane %v487_v30, 1  ;;  %v632_v46 = vadd.f32 %v631_v33, %v630_v18  ;;  %v639_v47 = vadd.f32 %v638_v34, %v637_v19 }
  0x74   : > { %v662_v44 = vadd.f32 %v661_v38, %v660_v36  ;;  %v656_v48 = vrot.slane %v655_v40, 2  ;;  %v455_v52 = vadd.f32 %v454_v15, %v453_v25  ;;  %v534_v53 = vmul.f32 %v532_v39, %v1282_v50 }
  0x75   : > { %v608_v43 = vrot.slane %v601_v37, %v1287_v59  ;;  %v462_v55 = vadd.f32 %v461_v41, %v460_v26  ;;  %v482_v56 = vadd.f32 %v481_v42, %v480_v29  ;;  %v489_v60 = vadd.f32 %v488_v45, %v487_v30 }
  0x76   : > { %v663_v51 = vrot.slane %v662_v44, 2  ;;  %v657_v54 = vadd.f32 %v656_v48, %v655_v40  ;;  %v633_v61 = vrot.slane %v632_v46, 1  ;;  %v640_v62 = vrot.slane %v639_v47, 1 }
  0x77   : > { %v609_v49 = vrot.slane %v608_v43, 7  ;;  %v670_v59 = vsub.s32 0, %v1265_v21  ;;  %v674_v2 = vsub.s32 2, %v1265_v21  ;;  %v678_v4 = vsel %vm576_vm9, %v455_v52, %v482_v56 }
  0x78   : > { %v664_v58 = vadd.f32 %v663_v51, %v662_v44  ;;  %v658_v0 = vrot.slane %v657_v54, 1  ;;  %v634_v5 = vadd.f32 %v633_v61, %v632_v46  ;;  %v641_v6 = vadd.f32 %v640_v62, %v639_v47 }
  0x79   : > { %v611_v57 = vmul.f32 %v609_v49, %v1282_v50  ;;  %v679_v50 = vsel %vm576_vm9, %v462_v55, %v489_v60  ;;  %vm682_vm10 = vcmask 1042432   ;;  %vm685_vm11 = vcmask 1043456  }
  0x7a   : > { %v665_v1 = vrot.slane %v664_v58, 1  ;;  %v659_v7 = vadd.f32 %v658_v0, %v657_v54  ;;  %vm688_vm12 = vcmask 1044480  }
  0x7b   : > { %v886_v63 = vrot.slane %v611_v57, 9 }
  0x7c   : > { %v666_v8 = vadd.f32 %v665_v1, %v664_v58 }
  0x7d   : > { %v616_v3 = vadd.f32 %v886_v63, %v534_v53 }
  0x7f   : > { %v671_v9 = vrot.slane %v616_v3, %v670_v59  ;;  %v675_v10 = vrot.slane %v616_v3, %v674_v2 }
  0x81   : > { %v680_v11 = vsel %vm448_vm4, %v678_v4, %v671_v9  ;;  %v681_v21 = vsel %vm448_vm4, %v679_v50, %v675_v10 }
  0x82   : > { %v683_v12 = vsel %vm682_vm10, %v680_v11, %v634_v5  ;;  %v684_v13 = vsel %vm682_vm10, %v681_v21, %v641_v6 }
  0x83   : > { %v686_v17 = vsel %vm685_vm11, %v683_v12, %v659_v7  ;;  %v687_v18 = vsel %vm685_vm11, %v684_v13, %v666_v8 }
  0x84   : > { %v689_v19 = vsel %vm688_vm12, %v686_v17, 0.0  ;;  %v690_v20 = vsel %vm688_vm12, %v687_v18, 0.0 }
  0x85   : > { %v693_v22 = vadd.f32 %v691_v14, %v689_v19  ;;  %v694_v23 = vadd.f32 %v692_v16, %v690_v20 }
  0x87   : > { %695 = vst [vmem:[%s1254_s29] sm:$0xff] %v693_v22  ;;  %696 = vst [vmem:[%s1254_s29 + $0x8] sm:$0xff] %v694_v23 }
  0x88   : > { %1000 = shalt.err (!%p997_p0)
}
  0x89   : > { %s1001_s29 = scalar_lea.hbm %s1350_s13, 256  ;;  %s1005_s25 = scalar_lea.hbm %s1417_s4, 512 }
  0x8a   : > { %p1002_p1 = scmp.ne.s32.totalorder %s1350_s13, %s1001_s29  ;;  %p1006_p4 = scmp.lt.u32.totalorder %s1350_s13, %s1417_s4 }
  0x8b   : > { %p1007_p5 = scmp.lt.u32.totalorder %s1005_s25, %s1001_s29  ;;  %p1009_p8 = scmp.lt.u32.totalorder %s1001_s29, %s1350_s13 }
  0x8c   : > { %p1003_p2 = pnand %p1002_p1, %p1200_p7 }
  0x8d   : > { %p1008_p6 = por %p1007_p5, %p1006_p4 }
  0x8e   : > { %p1004_p3 = pneg %p1003_p2 }
  0x8f   : > { %p1010_p9 = por %p1009_p8, %p1008_p6 }
  0x91   : > { %p1011_p10 = pnand %p1010_p9, %p1004_p3 }
  0x93   : > { %1014 = shalt.err (!%p1011_p10)
}
  0x94   : > { %893 = dma.vmem_to_hbm [thread:$0]  (%p1200_p7), %s1352_s20, 256, %s1350_s13, %s698_s2  }
  0x95 PF: > { %p899_p11 = scmp.ge.s32.totalorder %s1097_s24, 2  ;;  %s725_s5 = sand.u32 1, %s1061_s15  }
  0x96   : > { %s726_s3 = scalar_lea.sflag [#allocation5], %s725_s5 }
  0x97   : > { %p896_p13 = pnand %p899_p11, %p1208_p12 }
  0x99   : > { %1056 = dma.done.wait (!%p896_p13), %s726_s3, 256  }
  0x9a   : > { %1058 = vsyncadd (!%p896_p13), %s726_s3, 4294967040  ;;  %s17_s24 = sadd.s32 1, %s1097_s24   ;;  %s1443_s21 = sld [smem:[#allocation7_spill]] }
  0x9b   : > { %p14_p0 = scmp.ge.s32.totalorder %s17_s24, 10   ;;  %s1444_s7 = sld [smem:[#allocation8_spill]] }
  0x9c   : > { %s1445_s23 = sld [smem:[#allocation9_spill]]  ;;  %s1446_s15 = smov %s1065_s16 }
  0x9d   : > { %s1447_s16 = smov %s1069_s17  ;;  %s1448_s17 = smov %s1213_s11 }
  0x9e   : > { %s1449_s18 = smov %s1077_s19  ;;  %s1450_s19 = smov %s1216_s12 }
  0x9f   : > { %s1451_s20 = smov %s1089_s22  ;;  %16 = sbr.rel (!%p14_p0) target bundleno = 9 (0x9), region = 140 }
  0xa1   : > { %s1452_s22 = smov %s1444_s7 }
  0xa6   :  { %731 = vsyncpa [#allocation5], 1 }
  0xa7   :  { %733 = vsyncpa [#allocation5 + $0x1], 1 }

</bundles_post_ra>
